<compile_context>
chip_gen: v7x
topology: tpu7x:2x2x1
jax: 0.10.0
libtpu: 0.0.40
codegen_flags: <defaults>
</compile_context>

<pallas_src>
import numpy as np
import jax
import jax.numpy as jnp
from jax.experimental import pallas as pl
from jax.experimental.pallas import tpu as pltpu


# ----------------------------- kernel ---------------------------------------


def _fused_policy_value_kernel(xt_ref, w1_ref, b1_ref, w2_ref, b2_ref,
                               w3_ref, b3_ref, out_ref):
    # xt_ref: [D, tb]   (batch on lanes)
    # w1: [2H1, D], w2: [2H2, 2H1] (block-diag), w3: [A+1, 2H2] (block rows)
    # biases are column vectors; out_ref: [A+1, tb] = [mean rows ; value row].
    w1 = w1_ref[...]
    h = jnp.dot(w1, xt_ref[...].astype(w1.dtype),
                preferred_element_type=jnp.float32) + b1_ref[...]
    h = jnp.tanh(h)

    w2 = w2_ref[...]
    h = jnp.dot(w2, h.astype(w2.dtype),
                preferred_element_type=jnp.float32) + b2_ref[...]
    h = jnp.tanh(h)

    w3 = w3_ref[...]
    out_ref[...] = (jnp.dot(w3, h.astype(w3.dtype),
                            preferred_element_type=jnp.float32) + b3_ref[...])


# ----------------------------- wrapper ---------------------------------------


def _pick_batch_tile(B):
    # Lane-multiple tiles when B allows; per-tile VMEM is tiny here
    # (x tile tb*D*4B + out tile tb*(A+1)*4B, double-buffered), so 2048 stays
    # far inside even v7x's 64 MiB physical / 32 MiB scoped VMEM budget.
    for tb in (2048, 1024, 512, 256, 128):
        if B % tb == 0:
            return tb
    return B  # small/odd batches: one full-array block (legal: equals full dim)


def policy_nn_forward(x, params, compute_dtype=jnp.float32):
    """PolicyNN.forward.  x: [B, dim_state] f32. Returns (logits [B,2A], value [B,1])."""
    B, D = x.shape
    fp = params["fused"]
    A = params["dim_action"]

    tb = _pick_batch_tile(B)
    grid = (B // tb,)

    # Batch on lanes: kernel consumes / produces transposed slabs.
    xt = x.T.astype(compute_dtype)                     # [D, B]
    w1 = fp["w1t"].astype(compute_dtype)
    w2 = fp["w2t"].astype(compute_dtype)
    w3 = fp["w3t"].astype(compute_dtype)

    def const2d(shape):                                # VMEM-resident across tiles
        return pl.BlockSpec(shape, lambda i: (0, 0))

    fn = pl.pallas_call(
        _fused_policy_value_kernel,
        grid=grid,
        in_specs=[
            pl.BlockSpec((D, tb), lambda i: (0, i)),   # xT tile (lane-dense)
            const2d(w1.shape), const2d(fp["b1"].shape),
            const2d(w2.shape), const2d(fp["b2"].shape),
            const2d(w3.shape), const2d(fp["b3"].shape),
        ],
        out_specs=pl.BlockSpec((A + 1, tb), lambda i: (0, i)),
        out_shape=jax.ShapeDtypeStruct((A + 1, B), jnp.float32),
        compiler_params=pltpu.CompilerParams(
            dimension_semantics=("parallel",)),
    )
    out_t = fn(xt, w1, fp["b1"], w2, fp["b2"], w3, fp["b3"])   # [A+1, B]

    mean = out_t[:A, :].T                                      # [B, A]
    value = out_t[A:, :].T                                     # [B, 1]
    # AppendLogStd: constant per-action log_std, concatenated in XLA.
    log_std = jnp.broadcast_to(params["log_std"], (B, A))
    logits = jnp.concatenate([mean, log_std], axis=-1)         # [B, 2A]
    return logits, value


# -------------------------- params / packing ---------------------------------


def _xavier_uniform(key, fan_in, fan_out, gain):
    bound = gain * np.sqrt(6.0 / (fan_in + fan_out))
    return jax.random.uniform(key, (fan_in, fan_out), jnp.float32, -bound, bound)


def _pack_fused_params(p, dim_action):
    """Fuse policy/value branches: 6 small matmuls -> 3 (concat / block-diagonal)."""
    A = dim_action
    H1 = p["p_w1"].shape[1]
    H2 = p["p_w2"].shape[1]

    w1t = jnp.concatenate([p["p_w1"].T, p["v_w1"].T], axis=0)           # [2H1, D]
    b1 = jnp.concatenate([p["p_b1"], p["v_b1"]], axis=1).T              # [2H1, 1]

    w2t = jnp.zeros((2 * H2, 2 * H1), jnp.float32)
    w2t = w2t.at[:H2, :H1].set(p["p_w2"].T).at[H2:, H1:].set(p["v_w2"].T)
    b2 = jnp.concatenate([p["p_b2"], p["v_b2"]], axis=1).T              # [2H2, 1]

    w3t = jnp.zeros((A + 1, 2 * H2), jnp.float32)
    w3t = w3t.at[:A, :H2].set(p["p_w3"].T).at[A:, H2:].set(p["v_w3"].T)
    b3 = jnp.concatenate([p["p_b3"], p["v_b3"]], axis=1).T              # [A+1, 1]

    return dict(w1t=w1t, b1=b1, w2t=w2t, b2=b2, w3t=w3t, b3=b3)


def init_policy_nn_params(key, dim_state, dim_action, hiddens, sample_std,
                          init_weights=(1.0, 1.0, 0.01)):
    """Synthetic init mirroring SlimFC + xavier_initializer(gain) of PolicyNN."""
    sizes_p = hiddens + [dim_action]
    sizes_v = hiddens + [1]          # value_fn reuses policy hiddens (per module)
    params = {}
    keys = jax.random.split(key, 6)
    prev = dim_state
    for i, (size, gain) in enumerate(zip(sizes_p, init_weights), start=1):
        params[f"p_w{i}"] = _xavier_uniform(keys[i - 1], prev, size, gain)
        params[f"p_b{i}"] = jnp.zeros((1, size), jnp.float32)
        prev = size
    prev = dim_state
    for i, (size, gain) in enumerate(zip(sizes_v, init_weights), start=1):
        params[f"v_w{i}"] = _xavier_uniform(keys[2 + i], prev, size, gain)
        params[f"v_b{i}"] = jnp.zeros((1, size), jnp.float32)
        prev = size
    # AppendLogStd constant (fixed_grad irrelevant for forward)
    params["log_std"] = jnp.full((1, dim_action), np.log(sample_std), jnp.float32)
    params["dim_action"] = dim_action
    params["fused"] = _pack_fused_params(params, dim_action)
    return params


# ----------------------------- reference --------------------------------------


def _reference_forward(x, p):
    """Pure-JAX reference of PolicyNN.forward for verification (unfused weights)."""
    h = jnp.tanh(x @ p["p_w1"] + p["p_b1"])
    h = jnp.tanh(h @ p["p_w2"] + p["p_b2"])
    mean = h @ p["p_w3"] + p["p_b3"]
    logits = jnp.concatenate(
        [mean, jnp.broadcast_to(p["log_std"], mean.shape)], axis=-1)
    v = jnp.tanh(x @ p["v_w1"] + p["v_b1"])
    v = jnp.tanh(v @ p["v_w2"] + p["v_b2"])
    value = v @ p["v_w3"] + p["v_b3"]
    return logits, value


# ------------------------------- main ------------------------------------------


if __name__ == "__main__":
    key = jax.random.PRNGKey(0)
    k_x, k_x2, k_p = jax.random.split(key, 3)

    dim_state = 32
    dim_action = 4
    policy_hiddens = [32, 32]        # model_config['policy_hiddens']
    sample_std = 0.3                 # model_config['sample_std']

    params = init_policy_nn_params(k_p, dim_state, dim_action,
                                   policy_hiddens, sample_std)

    # --- small batch (single tile path), f32 ---
    B = 8
    x = jax.random.normal(k_x, (B, dim_state), jnp.float32)
    logits, value = policy_nn_forward(x, params)
    jax.block_until_ready((logits, value))
    ref_logits, ref_value = _reference_forward(x, params)
    assert logits.shape == (B, 2 * dim_action)
    assert value.shape == (B, 1)
    np.testing.assert_allclose(np.asarray(logits), np.asarray(ref_logits),
                               rtol=1e-5, atol=1e-5)
    np.testing.assert_allclose(np.asarray(value), np.asarray(ref_value),
                               rtol=1e-5, atol=1e-5)

    # --- larger batch: exercises lane-multiple tiling (tb=128, grid=2), f32 ---
    B2 = 256
    x2 = jax.random.normal(k_x2, (B2, dim_state), jnp.float32)
    logits2, value2 = policy_nn_forward(x2, params)
    jax.block_until_ready((logits2, value2))
    ref_logits2, ref_value2 = _reference_forward(x2, params)
    np.testing.assert_allclose(np.asarray(logits2), np.asarray(ref_logits2),
                               rtol=1e-5, atol=1e-5)
    np.testing.assert_allclose(np.asarray(value2), np.asarray(ref_value2),
                               rtol=1e-5, atol=1e-5)

    # --- bf16 MXU-operand path (f32 accumulation / bias / tanh), loose check ---
    logits3, value3 = policy_nn_forward(x2, params, compute_dtype=jnp.bfloat16)
    jax.block_until_ready((logits3, value3))
    np.testing.assert_allclose(np.asarray(logits3), np.asarray(ref_logits2),
                               rtol=5e-2, atol=3e-2)
    np.testing.assert_allclose(np.asarray(value3), np.asarray(ref_value2),
                               rtol=5e-2, atol=3e-2)

    print("KERNEL_OK")
</pallas_src>

<mosaic_0001>
module attributes {stable_mosaic.version = 11 : i64} {
  func.func @_fused_policy_value_kernel(%arg0: i32, %arg1: memref<32x8xf32, #tpu.memory_space<vmem>>, %arg2: memref<64x32xf32, #tpu.memory_space<vmem>>, %arg3: memref<64x1xf32, #tpu.memory_space<vmem>>, %arg4: memref<64x64xf32, #tpu.memory_space<vmem>>, %arg5: memref<64x1xf32, #tpu.memory_space<vmem>>, %arg6: memref<5x64xf32, #tpu.memory_space<vmem>>, %arg7: memref<5x1xf32, #tpu.memory_space<vmem>>, %arg8: memref<5x8xf32, #tpu.memory_space<vmem>>) attributes {dimension_semantics = [#tpu.dimension_semantics<parallel>], iteration_bounds = array<i64: 1>, scalar_prefetch = 0 : i64, scratch_operands = 0 : i64, tpu.core_type = #tpu.core_type<tc>, window_params = [{transform_indices = @transform_0, window_bounds = array<i64: 32, 8>}, {pipeline_mode = #tpu.pipeline_mode<synchronous>, transform_indices = @transform_1, window_bounds = array<i64: 64, 32>}, {pipeline_mode = #tpu.pipeline_mode<synchronous>, transform_indices = @transform_2, window_bounds = array<i64: 64, 1>}, {pipeline_mode = #tpu.pipeline_mode<synchronous>, transform_indices = @transform_3, window_bounds = array<i64: 64, 64>}, {pipeline_mode = #tpu.pipeline_mode<synchronous>, transform_indices = @transform_4, window_bounds = array<i64: 64, 1>}, {pipeline_mode = #tpu.pipeline_mode<synchronous>, transform_indices = @transform_5, window_bounds = array<i64: 5, 64>}, {pipeline_mode = #tpu.pipeline_mode<synchronous>, transform_indices = @transform_6, window_bounds = array<i64: 5, 1>}, {transform_indices = @transform_7, window_bounds = array<i64: 5, 8>}]} {
    %c0 = arith.constant 0 : index
    %c0_0 = arith.constant 0 : index
    %0 = vector.load %arg2[%c0, %c0_0] : memref<64x32xf32, #tpu.memory_space<vmem>>, vector<64x32xf32>
    %c0_1 = arith.constant 0 : index
    %c0_2 = arith.constant 0 : index
    %1 = vector.load %arg1[%c0_1, %c0_2] : memref<32x8xf32, #tpu.memory_space<vmem>>, vector<32x8xf32>
    %cst = arith.constant dense<0.000000e+00> : vector<64x8xf32>
    %2 = tpu.matmul %0, %1, %cst {dimension_numbers = #tpu.dot_dimension_numbers<[1], [0], [0], [1], [0, 0, 1, 1], [], []>} : vector<64x32xf32>, vector<32x8xf32>, vector<64x8xf32> -> vector<64x8xf32>
    %c0_3 = arith.constant 0 : index
    %c0_4 = arith.constant 0 : index
    %3 = vector.load %arg3[%c0_3, %c0_4] : memref<64x1xf32, #tpu.memory_space<vmem>>, vector<64x1xf32>
    %4 = vector.broadcast %3 : vector<64x1xf32> to vector<64x8xf32>
    %5 = arith.addf %2, %4 : vector<64x8xf32>
    %6 = math.tanh %5 : vector<64x8xf32>
    %c0_5 = arith.constant 0 : index
    %c0_6 = arith.constant 0 : index
    %7 = vector.load %arg4[%c0_5, %c0_6] : memref<64x64xf32, #tpu.memory_space<vmem>>, vector<64x64xf32>
    %cst_7 = arith.constant dense<0.000000e+00> : vector<64x8xf32>
    %8 = tpu.matmul %7, %6, %cst_7 {dimension_numbers = #tpu.dot_dimension_numbers<[1], [0], [0], [1], [0, 0, 1, 1], [], []>} : vector<64x64xf32>, vector<64x8xf32>, vector<64x8xf32> -> vector<64x8xf32>
    %c0_8 = arith.constant 0 : index
    %c0_9 = arith.constant 0 : index
    %9 = vector.load %arg5[%c0_8, %c0_9] : memref<64x1xf32, #tpu.memory_space<vmem>>, vector<64x1xf32>
    %10 = vector.broadcast %9 : vector<64x1xf32> to vector<64x8xf32>
    %11 = arith.addf %8, %10 : vector<64x8xf32>
    %12 = math.tanh %11 : vector<64x8xf32>
    %c0_10 = arith.constant 0 : index
    %c0_11 = arith.constant 0 : index
    %13 = vector.load %arg6[%c0_10, %c0_11] : memref<5x64xf32, #tpu.memory_space<vmem>>, vector<5x64xf32>
    %cst_12 = arith.constant dense<0.000000e+00> : vector<5x8xf32>
    %14 = tpu.matmul %13, %12, %cst_12 {dimension_numbers = #tpu.dot_dimension_numbers<[1], [0], [0], [1], [0, 0, 1, 1], [], []>} : vector<5x64xf32>, vector<64x8xf32>, vector<5x8xf32> -> vector<5x8xf32>
    %c0_13 = arith.constant 0 : index
    %c0_14 = arith.constant 0 : index
    %15 = vector.load %arg7[%c0_13, %c0_14] : memref<5x1xf32, #tpu.memory_space<vmem>>, vector<5x1xf32>
    %16 = vector.broadcast %15 : vector<5x1xf32> to vector<5x8xf32>
    %17 = arith.addf %14, %16 : vector<5x8xf32>
    %c0_15 = arith.constant 0 : index
    %c0_16 = arith.constant 0 : index
    %18 = vector.load %arg8[%c0_15, %c0_16] : memref<5x8xf32, #tpu.memory_space<vmem>>, vector<5x8xf32>
    tpu.vector_store %arg8[%c0_15, %c0_16], %17 {strides = array<i32>} : memref<5x8xf32, #tpu.memory_space<vmem>>, vector<5x8xf32>,
    return
  }
  func.func @transform_0(%arg0: i32) -> (i32, i32) {
    %c0_i32 = arith.constant 0 : i32
    %c0_i32_0 = arith.constant 0 : i32
    return %c0_i32, %arg0 : i32, i32
  }
  func.func @transform_1(%arg0: i32) -> (i32, i32) {
    %c0_i32 = arith.constant 0 : i32
    %c0_i32_0 = arith.constant 0 : i32
    %c0_i32_1 = arith.constant 0 : i32
    return %c0_i32, %c0_i32_0 : i32, i32
  }
  func.func @transform_2(%arg0: i32) -> (i32, i32) {
    %c0_i32 = arith.constant 0 : i32
    %c0_i32_0 = arith.constant 0 : i32
    %c0_i32_1 = arith.constant 0 : i32
    return %c0_i32, %c0_i32_0 : i32, i32
  }
  func.func @transform_3(%arg0: i32) -> (i32, i32) {
    %c0_i32 = arith.constant 0 : i32
    %c0_i32_0 = arith.constant 0 : i32
    %c0_i32_1 = arith.constant 0 : i32
    return %c0_i32, %c0_i32_0 : i32, i32
  }
  func.func @transform_4(%arg0: i32) -> (i32, i32) {
    %c0_i32 = arith.constant 0 : i32
    %c0_i32_0 = arith.constant 0 : i32
    %c0_i32_1 = arith.constant 0 : i32
    return %c0_i32, %c0_i32_0 : i32, i32
  }
  func.func @transform_5(%arg0: i32) -> (i32, i32) {
    %c0_i32 = arith.constant 0 : i32
    %c0_i32_0 = arith.constant 0 : i32
    %c0_i32_1 = arith.constant 0 : i32
    return %c0_i32, %c0_i32_0 : i32, i32
  }
  func.func @transform_6(%arg0: i32) -> (i32, i32) {
    %c0_i32 = arith.constant 0 : i32
    %c0_i32_0 = arith.constant 0 : i32
    %c0_i32_1 = arith.constant 0 : i32
    return %c0_i32, %c0_i32_0 : i32, i32
  }
  func.func @transform_7(%arg0: i32) -> (i32, i32) {
    %c0_i32 = arith.constant 0 : i32
    %c0_i32_0 = arith.constant 0 : i32
    return %c0_i32, %arg0 : i32, i32
  }
}

</mosaic_0001>

<bundles_post_ra>
// kernel: tpu_custom_call.1
= control target key start
LH: loop header
LB: loop body
LE: loop exit
PB: predicated region body
PF: predicated region fallthrough
CT: control target
= control target key end

     0   :  { %vm87_vm0 = vcmask 261120   ;;  %v735_v6 = vmov 0   ;;  %s923_s0 = inlined_call_operand.vmem [shape: f32[32,8], index: 0, kind: input, shape index: {}]   ;;  %s924_s1 = inlined_call_operand.vmem [shape: f32[64,32], index: 1, kind: input, shape index: {}]   ;;  %s925_s2 = inlined_call_operand.vmem [shape: f32[64,1], index: 2, kind: input, shape index: {}]   ;;  %s926_s3 = inlined_call_operand.vmem [shape: f32[64,64], index: 3, kind: input, shape index: {}]   ;;  %s927_s4 = inlined_call_operand.vmem [shape: f32[64,1], index: 4, kind: input, shape index: {}]   ;;  %s928_s5 = inlined_call_operand.vmem [shape: f32[5,64], index: 5, kind: input, shape index: {}]   ;;  %s929_s6 = inlined_call_operand.vmem [shape: f32[5,1], index: 6, kind: input, shape index: {}]   ;;  %s930_s7 = inlined_call_operand.hbm [shape: f32[5,8], index: 7, kind: output, shape index: {}]  }
   0x1   :  { %v35_v0 = vld [vmem:[%s923_s0] sm:$0xff]  ;;  %v36_v1 = vld [vmem:[%s923_s0 + $0x8] sm:$0xff]  ;;  %v37_v2 = vld [vmem:[%s923_s0 + $0x10] sm:$0xff]  ;;  %677 = vset.pattern.permute.xlu0 %v735_v6  ;;  %678 = vset.pattern.permute.xlu1 %v735_v6 }
   0x2   :  { %v636_v3 = vpack.c.bf16 %v36_v1, %v35_v0  ;;  %v38_v4 = vld [vmem:[%s923_s0 + $0x18] sm:$0xff]  ;;  %v27_v5 = vld [vmem:[%s924_s1] sm:$0xff]  ;;  %v41_v9 = vld [vmem:[%s925_s2 + $0x10] sm:$0xff] }
   0x3   :  { %v640_v7 = vpack.c.bf16 %v38_v4, %v37_v2  ;;  %577 = vmatprep.mubr.msk.f32.mxu0 %vm87_vm0, %v27_v5  ;;  %v39_v8 = vld [vmem:[%s925_s2] sm:$0xff]  ;;  %v40_v10 = vld [vmem:[%s925_s2 + $0x8] sm:$0xff]  ;;  %59 = vperm.xlu1 %678, %v41_v9   ;;  %v42_v11 = vld [vmem:[%s925_s2 + $0x18] sm:$0xff] }
   0x4   :  { %637 = vmatprep.subr.bf16.mxu0 %v636_v3  ;;  %49 = vperm.xlu0 %677, %v39_v8   ;;  %v28_v12 = vld [vmem:[%s924_s1 + $0x8] sm:$0xff]  ;;  %v29_v13 = vld [vmem:[%s924_s1 + $0x10] sm:$0xff] }
   0x5   :  { %639 = vmatpush3.bf16.msra.mxu0 %v636_v3 }
   0x6   :  { %641 = vmatprep.subr.bf16.mxu0 %v640_v7 }
   0x8   :  { %54 = vperm.xlu0 %677, %v40_v10  }
   0x9   :  { %643 = vmatpush3.bf16.msra.mxu0 %v640_v7 }
   0xa   :  { %12 = vsyncpa [#allocation3], 0  ;;  %v43_v14 = vld [vmem:[%s925_s2 + $0x20] sm:$0xff]  ;;  %64 = vperm.xlu1 %678, %v42_v11   ;;  %v44_v15 = vld [vmem:[%s925_s2 + $0x28] sm:$0xff]  ;;  %vm281_vm1 = vcmask 523264   ;;  %vm737_vm2 = vmmov 0  }
   0xb   :  { %v30_v16 = vld [vmem:[%s924_s1 + $0x18] sm:$0xff]  ;;  %v31_v17 = vld [vmem:[%s924_s1 + $0x20] sm:$0xff]  ;;  %v45_v18 = vld [vmem:[%s925_s2 + $0x30] sm:$0xff]  ;;  %s739_s22 = smov [#allocation2]   ;;  %vm499_vm3 = vcmask 61440  }
   0xc   :  { %578 = vmatmul.mubr.msk.f32.vlgmr.msra.gmra.mrb[0].mxu0 %vm87_vm0, %v28_v12  ;;  %69 = vperm.xlu0 %677, %v43_v14   ;;  %v46_v19 = vld [vmem:[%s925_s2 + $0x38] sm:$0xff]  ;;  %v32_v20 = vld [vmem:[%s924_s1 + $0x28] sm:$0xff]  ;;  %v33_v21 = vld [vmem:[%s924_s1 + $0x30] sm:$0xff]  ;;  %v736_v12 = vmov 0.0|0.0   ;;  %s507_s23 = sshll.u32 %s739_s22, 4  ;;  %s508_s23 = int_to_ptr.vmem [resolvable:$true] %s507_s23 }
   0xd   :  { %580 = vmatprep.mubr.msk.f32.mxu0 %vm87_vm0, %v29_v13  ;;  %v233_v22 = vld [vmem:[%s927_s4] sm:$0xff]  ;;  %v234_v23 = vld [vmem:[%s927_s4 + $0x8] sm:$0xff]  ;;  %v34_v24 = vld [vmem:[%s924_s1 + $0x38] sm:$0xff]  ;;  %660 = vmatprep.subr.bf16.mxu0 %v736_v12  ;;  %v738_v13 = vmov 0.0   ;;  %s711_s24 = scalar_lea.vmem %s508_s23, 128  ;;  %p716_p1 = scmp.lt.s32.totalorder %s508_s23, %s508_s23 }
   0xe   :  { %74 = vperm.xlu1 %678, %v44_v15   ;;  %v235_v25 = vld [vmem:[%s927_s4 + $0x10] sm:$0xff]  ;;  %v236_v26 = vld [vmem:[%s927_s4 + $0x18] sm:$0xff]  ;;  %v237_v27 = vld [vmem:[%s927_s4 + $0x20] sm:$0xff]  ;;  %p712_p0 = scmp.ne.s32.totalorder %s508_s23, %s711_s24  ;;  %p717_p2 = scmp.lt.s32.totalorder %s711_s24, %s711_s24 }
   0xf   :  { %v238_v28 = vld [vmem:[%s927_s4 + $0x28] sm:$0xff]  ;;  %v239_v29 = vld [vmem:[%s927_s4 + $0x30] sm:$0xff]  ;;  %v240_v30 = vld [vmem:[%s927_s4 + $0x38] sm:$0xff] }
  0x10   :  { %581 = vmatmul.mubr.msk.f32.gmra.mrb[2].mxu0 %vm87_vm0, %v30_v16  ;;  %79 = vperm.xlu0 %677, %v45_v18   ;;  %v420_v31 = vld [vmem:[%s929_s6] sm:$0x1f]  ;;  %v226_v5 = vld [vmem:[%s926_s3 + $0x8] sm:$0xff]  ;;  %v227_v6 = vld [vmem:[%s926_s3 + $0x10] sm:$0xff]  ;;  %p718_p3 = por %p717_p2, %p716_p1 }
  0x11   :  { %583 = vmatprep.mubr.msk.f32.mxu0 %vm87_vm0, %v31_v17  ;;  %v225_v32 = vld [vmem:[%s926_s3] sm:$0xff]  ;;  %v228_v7 = vld [vmem:[%s926_s3 + $0x18] sm:$0xff]  ;;  %v230_v9 = vld [vmem:[%s926_s3 + $0x28] sm:$0xff] }
  0x12   :  { %84 = vperm.xlu1 %678, %v46_v19   ;;  %605 = vmatprep.mubr.msk.f32.mxu1 %vm281_vm1, %v225_v32  ;;  %v229_v8 = vld [vmem:[%s926_s3 + $0x20] sm:$0xff]  ;;  %v231_v10 = vld [vmem:[%s926_s3 + $0x30] sm:$0xff]  ;;  %v232_v11 = vld [vmem:[%s926_s3 + $0x38] sm:$0xff]  ;;  %p719_p4 = pnand %p718_p3, %p712_p0 }
  0x14   :  { %584 = vmatmul.mubr.msk.f32.gmra.mrb[4].mxu0 %vm87_vm0, %v32_v20  ;;  %243 = vperm.xlu0 %677, %v233_v22  }
  0x15   :  { %586 = vmatprep.mubr.msk.f32.mxu0 %vm87_vm0, %v33_v21 }
  0x16   :  { %248 = vperm.xlu1 %678, %v234_v23  }
  0x18   :  { %587 = vmatmul.mubr.msk.f32.gmra.mrb[6].mxu0 %vm87_vm0, %v34_v24  ;;  %253 = vperm.xlu0 %677, %v235_v25  }
  0x19   :  { %633 = vmatprep.mubr.msk.f32.mxu0 %vm737_vm2, %v738_v13 }
  0x1a   :  { %258 = vperm.xlu1 %678, %v236_v26  }
  0x1c   :  { %263 = vperm.xlu0 %677, %v237_v27  }
  0x1e   :  { %268 = vperm.xlu1 %678, %v238_v28  }
  0x20   :  { %273 = vperm.xlu0 %677, %v239_v29  }
  0x22   :  { %278 = vperm.xlu1 %678, %v240_v30  }
  0x24   :  { %423 = vperm.xlu0 %677, %v420_v31  }
  0x82   :  { %v60_v34 = vpop.permute.xlu1 %59 }
  0x83   :  { %v50_v33 = vpop.permute.xlu0 %49 }
  0x87   :  { %v55_v35 = vpop.permute.xlu0 %54 }
  0x89   :  { %v65_v36 = vpop.permute.xlu1 %64 }
  0x8b   :  { %v70_v46 = vpop.permute.xlu0 %69 }
  0x8d   :  { %v75_v44 = vpop.permute.xlu1 %74 }
  0x8f   :  { %v80_v54 = vpop.permute.xlu0 %79 }
  0x91   :  { %v85_v51 = vpop.permute.xlu1 %84 }
  0x93   :  { %v244_v15 = vpop.permute.xlu0 %243 }
  0x95   :  { %v249_v14 = vpop.permute.xlu1 %248 }
  0x97   :  { %v254_v18 = vpop.permute.xlu0 %253 }
  0x99   :  { %v259_v16 = vpop.permute.xlu1 %258 }
  0x9b   :  { %v264_v27 = vpop.permute.xlu0 %263 }
  0x9d   :  { %v269_v25 = vpop.permute.xlu1 %268 }
  0xa1   :  { %v279_v32 = vpop.permute.xlu1 %278 }
  0xdf   :  { %v579_v37 = vpop.f32.mrb[0].mxu0 }
  0xe0   :  { %v184_v38 = vadd.f32 %v579_v37, %v55_v35  ;;  %v178_v39 = vpop.f32.mrb[1].mxu0  ;;  %v274_v35 = vpop.permute.xlu0 %273 }
  0xe1   :  { %v179_v40 = vadd.f32 %v178_v39, %v50_v33 }
  0xe2   :  { %679 = vtanh.f32 %v184_v38 }
  0xe3   :  { %681 = vtanh.f32 %v179_v40  ;;  %v582_v41 = vpop.f32.mrb[2].mxu0 }
  0xe4   :  { %v194_v42 = vadd.f32 %v582_v41, %v65_v36  ;;  %v188_v43 = vpop.f32.mrb[3].mxu0 }
  0xe5   :  { %v189_v45 = vadd.f32 %v188_v43, %v60_v34 }
  0xe6   :  { %683 = vtanh.f32 %v194_v42 }
  0xe7   :  { %685 = vtanh.f32 %v189_v45  ;;  %v585_v47 = vpop.f32.mrb[4].mxu0 }
  0xe8   :  { %v204_v48 = vadd.f32 %v585_v47, %v75_v44  ;;  %v198_v49 = vpop.f32.mrb[5].mxu0 }
  0xe9   :  { %v199_v50 = vadd.f32 %v198_v49, %v70_v46 }
  0xea   :  { %687 = vtanh.f32 %v204_v48 }
  0xeb   :  { %689 = vtanh.f32 %v199_v50  ;;  %v588_v52 = vpop.f32.mrb[6].mxu0  ;;  %v419_v50 = vld [vmem:[%s928_s5] sm:$0x1f] }
  0xec   :  { %v680_v53 = vpop.eup %679  ;;  %v214_v55 = vadd.f32 %v588_v52, %v85_v51  ;;  %v208_v56 = vpop.f32.mrb[7].mxu0 }
  0xed   :  { %v682_v57 = vpop.eup %681  ;;  %v209_v58 = vadd.f32 %v208_v56, %v80_v54  ;;  %v424_v51 = vpop.permute.xlu0 %423 }
  0xee   :  { %691 = vtanh.f32 %v214_v55  ;;  %v644_v59 = vpack.c.bf16 %v680_v53, %v682_v57 }
  0xef   :  { %693 = vtanh.f32 %v209_v58 }
  0xf0   :  { %v684_v60 = vpop.eup %683  ;;  %645 = vmatprep.subr.bf16.mxu1 %v644_v59 }
  0xf1   :  { %v686_v61 = vpop.eup %685  ;;  %647 = vmatpush3.bf16.msra.mxu1 %v644_v59 }
  0xf2   :  { %v648_v62 = vpack.c.bf16 %v684_v60, %v686_v61 }
  0xf4   :  { %v688_v63 = vpop.eup %687  ;;  %649 = vmatprep.subr.bf16.mxu1 %v648_v62 }
  0xf5   :  { %v690_v0 = vpop.eup %689  ;;  %651 = vmatpush3.bf16.msra.mxu1 %v648_v62 }
  0xf6   :  { %v652_v1 = vpack.c.bf16 %v688_v63, %v690_v0 }
  0xf8   :  { %v692_v2 = vpop.eup %691  ;;  %653 = vmatprep.subr.bf16.mxu1 %v652_v1 }
  0xf9   :  { %v694_v3 = vpop.eup %693  ;;  %655 = vmatpush3.bf16.msra.mxu1 %v652_v1 }
  0xfa   :  { %v656_v4 = vpack.c.bf16 %v692_v2, %v694_v3 }
  0xfc   :  { %657 = vmatprep.subr.bf16.mxu1 %v656_v4 }
  0xfd   :  { %659 = vmatpush3.bf16.msra.mxu1 %v656_v4 }
 0x100   :  { %606 = vmatmul.mubr.msk.f32.vlgmr.msra.gmra.mrb[0].mxu1 %vm281_vm1, %v226_v5 }
 0x101   :  { %608 = vmatprep.mubr.msk.f32.mxu1 %vm281_vm1, %v227_v6 }
 0x104   :  { %609 = vmatmul.mubr.msk.f32.gmra.mrb[2].mxu1 %vm281_vm1, %v228_v7 }
 0x105   :  { %611 = vmatprep.mubr.msk.f32.mxu1 %vm281_vm1, %v229_v8 }
 0x108   :  { %612 = vmatmul.mubr.msk.f32.gmra.mrb[4].mxu1 %vm281_vm1, %v230_v9 }
 0x109   :  { %614 = vmatprep.mubr.msk.f32.mxu1 %vm281_vm1, %v231_v10 }
 0x10c   :  { %615 = vmatmul.mubr.msk.f32.gmra.mrb[6].mxu1 %vm281_vm1, %v232_v11 }
 0x1d3   :  { %v607_v17 = vpop.f32.mrb[0].mxu1 }
 0x1d4   :  { %v378_v19 = vadd.f32 %v607_v17, %v249_v14  ;;  %v372_v20 = vpop.f32.mrb[1].mxu1 }
 0x1d5   :  { %v373_v21 = vadd.f32 %v372_v20, %v244_v15 }
 0x1d6   :  { %695 = vtanh.f32 %v378_v19 }
 0x1d7   :  { %697 = vtanh.f32 %v373_v21  ;;  %v610_v22 = vpop.f32.mrb[2].mxu1 }
 0x1d8   :  { %v388_v23 = vadd.f32 %v610_v22, %v259_v16  ;;  %v382_v24 = vpop.f32.mrb[3].mxu1 }
 0x1d9   :  { %v383_v26 = vadd.f32 %v382_v24, %v254_v18 }
 0x1da   :  { %699 = vtanh.f32 %v388_v23 }
 0x1db   :  { %701 = vtanh.f32 %v383_v26  ;;  %v613_v28 = vpop.f32.mrb[4].mxu1 }
 0x1dc   :  { %v398_v29 = vadd.f32 %v613_v28, %v269_v25  ;;  %v392_v30 = vpop.f32.mrb[5].mxu1 }
 0x1dd   :  { %v393_v31 = vadd.f32 %v392_v30, %v264_v27 }
 0x1de   :  { %703 = vtanh.f32 %v398_v29 }
 0x1df   :  { %705 = vtanh.f32 %v393_v31  ;;  %v616_v33 = vpop.f32.mrb[6].mxu1 }
 0x1e0   :  { %v696_v34 = vpop.eup %695  ;;  %v408_v36 = vadd.f32 %v616_v33, %v279_v32  ;;  %v402_v37 = vpop.f32.mrb[7].mxu1 }
 0x1e1   :  { %v698_v38 = vpop.eup %697  ;;  %v403_v39 = vadd.f32 %v402_v37, %v274_v35 }
 0x1e2   :  { %707 = vtanh.f32 %v408_v36  ;;  %v661_v40 = vpack.c.bf16 %v696_v34, %v698_v38 }
 0x1e3   :  { %709 = vtanh.f32 %v403_v39 }
 0x1e4   :  { %v700_v41 = vpop.eup %699  ;;  %662 = vmatpush3.bf16.msra.mxu0 %v661_v40 }
 0x1e5   :  { %v702_v42 = vpop.eup %701  ;;  %663 = vmatprep.subr.bf16.mxu0 %v736_v12 }
 0x1e6   :  { %v664_v43 = vpack.c.bf16 %v700_v41, %v702_v42 }
 0x1e8   :  { %v704_v44 = vpop.eup %703  ;;  %665 = vmatpush3.bf16.msra.mxu0 %v664_v43 }
 0x1e9   :  { %v706_v45 = vpop.eup %705  ;;  %666 = vmatprep.subr.bf16.mxu0 %v736_v12 }
 0x1ea   :  { %v667_v46 = vpack.c.bf16 %v704_v44, %v706_v45 }
 0x1ec   :  { %v708_v47 = vpop.eup %707  ;;  %668 = vmatpush3.bf16.msra.mxu0 %v667_v46 }
 0x1ed   :  { %v710_v48 = vpop.eup %709  ;;  %669 = vmatprep.subr.bf16.mxu0 %v736_v12 }
 0x1ee   :  { %v670_v49 = vpack.c.bf16 %v708_v47, %v710_v48 }
 0x1f0   :  { %671 = vmatpush3.bf16.msra.mxu0 %v670_v49 }
 0x1f3   :  { %634 = vmatmul.mubr.msk.f32.vlgmr.msra.gmra.mrb[8].mxu0 %vm281_vm1, %v419_v50 }
 0x2c6   :  { %v495_v52 = vpop.f32.mrb[8].mxu0 }
 0x2c7   :  { %v496_v53 = vadd.f32 %v495_v52, %v424_v51  ;;  %v635_v54 = vpop.f32.mrb[9].mxu0 }
 0x2c9   :  { %500 = vst.msk [vmem:[#allocation2] sm:$0x1f] %vm499_vm3, %v496_v53 }
 0x2ca   :  { %722 = shalt.err (!%p719_p4)
}
 0x2cb   :  { %s723_s1 = scalar_lea.hbm %s930_s7, 128 }
 0x2cc   :  { %p724_p5 = scmp.ne.s32.totalorder %s930_s7, %s723_s1  ;;  %p727_p6 = scmp.lt.u32.totalorder %s723_s1, %s930_s7 }
 0x2ce   :  { %p729_p7 = pnand %p727_p6, %p724_p5 }
 0x2d0   :  { %732 = shalt.err (!%p729_p7)
}
 0x2d1   :  { %510 = dma.vmem_to_hbm [thread:$0]  %s508_s23, 128, %s930_s7, [#allocation3]  }
 0x2d2   :  { %733 = dma.done.wait [#allocation3], 128  }
 0x2d3   :  { %734 = vsyncadd [#allocation3], 4294967168 }
 0x2d4   :  { %514 = vsyncpa [#allocation3], 1 }

</bundles_post_ra>
